<compile_context>
chip_gen: v7x
topology: tpu7x:2x2x1
jax: 0.10.0
libtpu: 0.0.40
codegen_flags: <defaults>
</compile_context>

<pallas_src>
from functools import partial

import jax
import jax.numpy as jnp
from jax import lax
from jax.experimental import pallas as pl
from jax.experimental.pallas import tpu as pltpu

# ----------------------------------------------------------------------------
# ResNeXt-101 32x4d architecture constants
# ----------------------------------------------------------------------------
BLOCKS = (3, 4, 23, 3)                 # bottleneck blocks per stage
GROUPS = 32                            # cardinality
STAGE_WIDTH = (128, 256, 512, 1024)    # grouped-conv width D per stage
STAGE_OUT = (256, 512, 1024, 2048)     # stage output channels
STAGE_STRIDE = (1, 2, 2, 2)
BN_EPS = 1e-5

COMPUTE_DTYPE = jnp.bfloat16           # MXU-native; f32 accumulation inside kernels
VMEM_LIMIT = 48 * 1024 * 1024          # <= v7x physical VMEM (64 MiB)


def _pick_tile(dim, candidates):
    for t in candidates:
        if t <= dim and dim % t == 0:
            return t
    return dim


# ----------------------------------------------------------------------------
# Pallas kernels
# ----------------------------------------------------------------------------
def _dense_kernel_factory(relu, fuse_add):
    """K-tiled conv-as-GEMM + bias (+ fused residual) (+ ReLU)."""

    def _epilogue(acc_ref, bias_ref, r_ref, o_ref):
        y = acc_ref[...] + bias_ref[...]
        if r_ref is not None:
            y = y + r_ref[...].astype(jnp.float32)
        if relu:
            y = jnp.maximum(y, 0.0)
        o_ref[...] = y.astype(o_ref.dtype)

    if fuse_add:
        def kernel(a_ref, b_ref, bias_ref, r_ref, o_ref, acc_ref):
            @pl.when(pl.program_id(2) == 0)
            def _():
                acc_ref[...] = jnp.zeros_like(acc_ref)

            acc_ref[...] += jnp.dot(a_ref[...], b_ref[...],
                                    preferred_element_type=jnp.float32)

            @pl.when(pl.program_id(2) == pl.num_programs(2) - 1)
            def _():
                _epilogue(acc_ref, bias_ref, r_ref, o_ref)
    else:
        def kernel(a_ref, b_ref, bias_ref, o_ref, acc_ref):
            @pl.when(pl.program_id(2) == 0)
            def _():
                acc_ref[...] = jnp.zeros_like(acc_ref)

            acc_ref[...] += jnp.dot(a_ref[...], b_ref[...],
                                    preferred_element_type=jnp.float32)

            @pl.when(pl.program_id(2) == pl.num_programs(2) - 1)
            def _():
                _epilogue(acc_ref, bias_ref, None, o_ref)

    return kernel


def _grouped_gemm_kernel(a_ref, b_ref, bias_ref, o_ref):
    # a: (G, tm, Kg)  b: (G, Kg, cout_g)  bias: (G, 1, cout_g) -> o: (G, tm, cout_g)
    acc = jnp.einsum("gmk,gkn->gmn", a_ref[...], b_ref[...],
                     preferred_element_type=jnp.float32)
    o_ref[...] = jnp.maximum(acc + bias_ref[...], 0.0).astype(o_ref.dtype)


def _max9_kernel(x_ref, o_ref):
    # x_ref: (9, tm, C) -> elementwise max over the 9 pooling-window taps.
    r = x_ref[0]
    for i in range(1, 9):
        r = jnp.maximum(r, x_ref[i])
    o_ref[...] = r


# ----------------------------------------------------------------------------
# Pallas call wrappers
# ----------------------------------------------------------------------------
def gemm_bias_act(a, b, bias, residual=None, relu=True):
    """y = act(a @ b + bias [+ residual]); a:(M,K) bf16, b:(K,N) bf16, bias:(1,N) f32."""
    M, K = a.shape
    _, N = b.shape
    tm = _pick_tile(M, (256, 128, 64, 32, 16, 8))
    tn = _pick_tile(N, (512, 256, 128))
    tk = _pick_tile(K, (512, 256, 128))
    grid = (M // tm, N // tn, K // tk)

    in_specs = [
        pl.BlockSpec((tm, tk), lambda i, j, k: (i, k)),
        pl.BlockSpec((tk, tn), lambda i, j, k: (k, j)),
        pl.BlockSpec((1, tn), lambda i, j, k: (0, j)),
    ]
    args = [a, b, bias]
    if residual is not None:
        in_specs.append(pl.BlockSpec((tm, tn), lambda i, j, k: (i, j)))
        args.append(residual)

    return pl.pallas_call(
        _dense_kernel_factory(relu, residual is not None),
        out_shape=jax.ShapeDtypeStruct((M, N), a.dtype),
        grid_spec=pltpu.PrefetchScalarGridSpec(
            num_scalar_prefetch=0,
            grid=grid,
            in_specs=in_specs,
            out_specs=pl.BlockSpec((tm, tn), lambda i, j, k: (i, j)),
            scratch_shapes=[pltpu.VMEM((tm, tn), jnp.float32)],
        ),
        compiler_params=pltpu.CompilerParams(
            dimension_semantics=("parallel", "parallel", "arbitrary"),
            vmem_limit_bytes=VMEM_LIMIT,
        ),
    )(*args)


def grouped_gemm_bias_relu(a, b, bias):
    """Per-group GEMM + bias + ReLU. a:(G,M,Kg) bf16, b:(G,Kg,cout_g) bf16, bias:(G,1,cout_g) f32."""
    G, M, Kg = a.shape
    cout_g = b.shape[2]
    tm = _pick_tile(M, (256, 128, 64, 32, 16, 8))
    return pl.pallas_call(
        _grouped_gemm_kernel,
        out_shape=jax.ShapeDtypeStruct((G, M, cout_g), a.dtype),
        grid_spec=pltpu.PrefetchScalarGridSpec(
            num_scalar_prefetch=0,
            grid=(M // tm,),
            in_specs=[
                pl.BlockSpec((G, tm, Kg), lambda i: (0, i, 0)),
                pl.BlockSpec((G, Kg, cout_g), lambda i: (0, 0, 0)),  # weights resident
                pl.BlockSpec((G, 1, cout_g), lambda i: (0, 0, 0)),   # bias resident
            ],
            out_specs=pl.BlockSpec((G, tm, cout_g), lambda i: (0, i, 0)),
        ),
        compiler_params=pltpu.CompilerParams(
            dimension_semantics=("parallel",),
            vmem_limit_bytes=VMEM_LIMIT,
        ),
    )(a, b, bias)


@jax.jit
def maxpool3x3s2(x):
    """MaxPool2d(kernel=3, stride=2, padding=1) on NHWC input."""
    N, H, W, C = x.shape
    Ho = (H + 2 - 3) // 2 + 1
    Wo = (W + 2 - 3) // 2 + 1
    xp = jnp.pad(x, ((0, 0), (1, 1), (1, 1), (0, 0)),
                 constant_values=-jnp.inf)
    taps = []
    for kh in range(3):
        for kw in range(3):
            sl = lax.slice(xp,
                           (0, kh, kw, 0),
                           (N, kh + (Ho - 1) * 2 + 1, kw + (Wo - 1) * 2 + 1, C),
                           (1, 2, 2, 1))
            taps.append(sl.reshape(N * Ho * Wo, C))
    stacked = jnp.stack(taps, axis=0)              # (9, M, C)
    M = N * Ho * Wo
    tm = _pick_tile(M, (512, 256, 128, 64, 32, 16, 8))
    pooled = pl.pallas_call(
        _max9_kernel,
        out_shape=jax.ShapeDtypeStruct((M, C), x.dtype),
        grid_spec=pltpu.PrefetchScalarGridSpec(
            num_scalar_prefetch=0,
            grid=(M // tm,),
            in_specs=[pl.BlockSpec((9, tm, C), lambda i: (0, i, 0))],
            out_specs=pl.BlockSpec((tm, C), lambda i: (i, 0)),
        ),
        compiler_params=pltpu.CompilerParams(
            dimension_semantics=("parallel",)),
    )(stacked)
    return pooled.reshape(N, Ho, Wo, C)


# ----------------------------------------------------------------------------
# im2col glue (layout transform only; matmuls happen in the Pallas kernels)
# ----------------------------------------------------------------------------
def _im2col(x, k, stride, pad):
    N, H, W, C = x.shape
    Ho = (H + 2 * pad - k) // stride + 1
    Wo = (W + 2 * pad - k) // stride + 1
    if pad > 0:
        x = jnp.pad(x, ((0, 0), (pad, pad), (pad, pad), (0, 0)))
    if k == 1:
        if stride > 1:
            x = x[:, ::stride, ::stride, :]
        return x.reshape(N * Ho * Wo, C), Ho, Wo
    cols = []
    for kh in range(k):
        for kw in range(k):
            sl = lax.slice(x,
                           (0, kh, kw, 0),
                           (N, kh + (Ho - 1) * stride + 1,
                            kw + (Wo - 1) * stride + 1, C),
                           (1, stride, stride, 1))
            cols.append(sl)                         # (N, Ho, Wo, C)
    patches = jnp.stack(cols, axis=3)               # (N, Ho, Wo, k*k, C) [kh-major]
    return patches.reshape(N * Ho * Wo, k * k * C), Ho, Wo


@partial(jax.jit, static_argnames=("k", "stride", "pad", "relu"))
def conv_bn(x, p, k, stride, pad, relu, residual=None):
    """Conv2d(bias=False)+folded BN (+fused residual) (+ReLU). NHWC, bf16."""
    N = x.shape[0]
    cout = p["w"].shape[1]
    patches, Ho, Wo = _im2col(x, k, stride, pad)
    r = None if residual is None else residual.reshape(N * Ho * Wo, cout)
    y = gemm_bias_act(patches, p["w"], p["bias"], residual=r, relu=relu)
    return y.reshape(N, Ho, Wo, cout)


@partial(jax.jit, static_argnames=("stride",))
def grouped_conv_bn(x, p, stride):
    """Grouped 3x3 conv + folded BN + ReLU, as a true per-group GEMM. NHWC, bf16."""
    N, H, W, C = x.shape
    G = p["w"].shape[0]
    cin_g = C // G
    cout_g = p["w"].shape[2]
    # channels are group-major: group g owns in-channels [g*cin_g, (g+1)*cin_g)
    xg = (x.reshape(N, H, W, G, cin_g)
            .transpose(3, 0, 1, 2, 4)
            .reshape(G * N, H, W, cin_g))
    patches, Ho, Wo = _im2col(xg, 3, stride, 1)     # (G*N*Ho*Wo, 9*cin_g)
    M = N * Ho * Wo
    a = patches.reshape(G, M, 9 * cin_g)
    y = grouped_gemm_bias_relu(a, p["w"], p["bias"])  # (G, M, cout_g)
    return y.transpose(1, 0, 2).reshape(N, Ho, Wo, G * cout_g)


# ----------------------------------------------------------------------------
# Parameter initialization (deterministic, synthetic; BN scale folded into w)
# ----------------------------------------------------------------------------
def _bn_scale_bias(k2, k3, k4, k5, cout):
    gamma = 1.0 + 0.1 * jax.random.normal(k2, (cout,), jnp.float32)
    beta = 0.1 * jax.random.normal(k3, (cout,), jnp.float32)
    mean = 0.1 * jax.random.normal(k4, (cout,), jnp.float32)
    var = jnp.abs(jax.random.normal(k5, (cout,), jnp.float32)) + 1.0
    scale = gamma / jnp.sqrt(var + BN_EPS)
    bias = beta - mean * scale
    return scale, bias


def _conv_bn_params(key, cin, cout, k, std=0.05):
    k1, k2, k3, k4, k5 = jax.random.split(key, 5)
    w = jax.random.normal(k1, (k, k, cin, cout), jnp.float32) * std
    scale, bias = _bn_scale_bias(k2, k3, k4, k5, cout)
    w = (w * scale).reshape(k * k * cin, cout).astype(COMPUTE_DTYPE)
    return {"w": w, "bias": bias.reshape(1, cout)}


def _grouped_conv_bn_params(key, cin, cout, groups, std=0.05):
    cin_g, cout_g = cin // groups, cout // groups
    k1, k2, k3, k4, k5 = jax.random.split(key, 5)
    w = jax.random.normal(k1, (groups, 3, 3, cin_g, cout_g), jnp.float32) * std
    scale, bias = _bn_scale_bias(k2, k3, k4, k5, cout)
    scale_g = scale.reshape(groups, 1, 1, 1, cout_g)
    w = (w * scale_g).reshape(groups, 9 * cin_g, cout_g).astype(COMPUTE_DTYPE)
    return {"w": w, "bias": bias.reshape(groups, 1, cout_g)}


def init_resnext101_params(key):
    params = {"stem": _conv_bn_params(jax.random.fold_in(key, 0), 3, 64, 7)}
    stages = []
    cin = 64
    idx = 1
    for nblocks, width, cout, stride in zip(BLOCKS, STAGE_WIDTH, STAGE_OUT, STAGE_STRIDE):
        blocks = []
        for b in range(nblocks):
            bst = stride if b == 0 else 1
            kb = jax.random.fold_in(key, idx)
            idx += 1
            k1, k2, k3, k4 = jax.random.split(kb, 4)
            blk = {
                "conv1": _conv_bn_params(k1, cin, width, 1),
                "conv2": _grouped_conv_bn_params(k2, width, width, GROUPS),
                "conv3": _conv_bn_params(k3, width, cout, 1),
                "stride": bst,
            }
            if b == 0:
                blk["down"] = _conv_bn_params(k4, cin, cout, 1)
            blocks.append(blk)
            cin = cout
        stages.append(blocks)
    params["stages"] = stages
    return params


# ----------------------------------------------------------------------------
# Forward pass (matches torch ResNeXt101.forward: returns [layer0..layer4])
# ----------------------------------------------------------------------------
def _bottleneck(x, blk):
    s = blk["stride"]
    out = conv_bn(x, blk["conv1"], k=1, stride=1, pad=0, relu=True)
    out = grouped_conv_bn(out, blk["conv2"], stride=s)
    if "down" in blk:
        sc = conv_bn(x, blk["down"], k=1, stride=s, pad=0, relu=False)
    else:
        sc = x
    # conv3 with the residual add + ReLU fused into the GEMM epilogue
    return conv_bn(out, blk["conv3"], k=1, stride=1, pad=0, relu=True,
                   residual=sc)


def resnext101_forward(params, x_nchw):
    # NCHW (PyTorch convention) -> NHWC bf16 for the kernels
    x = jnp.transpose(x_nchw, (0, 2, 3, 1)).astype(COMPUTE_DTYPE)

    # layer0 = Conv7x7/s2 + BN + ReLU
    layer0 = conv_bn(x, params["stem"], k=7, stride=2, pad=3, relu=True)

    # layer1 = MaxPool3x3/s2 + stage 1; layer2..4 = stages 2..4
    h = maxpool3x3s2(layer0)
    feats = []
    for stage in params["stages"]:
        for blk in stage:
            h = _bottleneck(h, blk)
        feats.append(h)

    outs = [layer0] + feats
    # back to NCHW / f32 to match PyTorch outputs
    return [jnp.transpose(t, (0, 3, 1, 2)).astype(jnp.float32) for t in outs]


# ----------------------------------------------------------------------------
if __name__ == "__main__":
    key = jax.random.PRNGKey(0)
    pkey, xkey = jax.random.split(key)

    params = init_resnext101_params(pkey)
    x = jax.random.normal(xkey, (2, 3, 64, 64), jnp.float32)   # small NCHW input

    outs = resnext101_forward(params, x)
    outs = jax.block_until_ready(outs)

    expected = [(2, 64, 32, 32), (2, 256, 16, 16), (2, 512, 8, 8),
                (2, 1024, 4, 4), (2, 2048, 2, 2)]
    assert [tuple(o.shape) for o in outs] == expected
    assert all(o.dtype == jnp.float32 for o in outs)
    assert all(bool(jnp.all(jnp.isfinite(o))) for o in outs)

    print("KERNEL_OK")
</pallas_src>

<mosaic_0001>
module attributes {stable_mosaic.version = 11 : i64} {
  func.func @kernel(%arg0: i32, %arg1: i32, %arg2: i32, %arg3: memref<256x147xbf16, #tpu.memory_space<vmem>>, %arg4: memref<147x64xbf16, #tpu.memory_space<vmem>>, %arg5: memref<1x64xf32, #tpu.memory_space<vmem>>, %arg6: memref<256x64xbf16, #tpu.memory_space<vmem>>, %arg7: memref<256x64xf32, #tpu.memory_space<vmem>>) attributes {dimension_semantics = [#tpu.dimension_semantics<parallel>, #tpu.dimension_semantics<parallel>, #tpu.dimension_semantics<arbitrary>], iteration_bounds = array<i64: 8, 1, 1>, scalar_prefetch = 0 : i64, scratch_operands = 1 : i64, tpu.core_type = #tpu.core_type<tc>, window_params = [{transform_indices = @transform_0, window_bounds = array<i64: 256, 147>}, {transform_indices = @transform_1, window_bounds = array<i64: 147, 64>}, {transform_indices = @transform_2, window_bounds = array<i64: 1, 64>}, {transform_indices = @transform_3, window_bounds = array<i64: 256, 64>}]} {
    %c0_i32 = arith.constant 0 : i32
    %0 = arith.cmpi eq, %arg2, %c0_i32 : i32
    %1 = arith.extui %0 : i1 to i32
    %c0_i32_0 = arith.constant 0 : i32
    %2 = arith.cmpi ne, %1, %c0_i32_0 : i32
    scf.if %2 {
      %cst_10 = arith.constant 0.000000e+00 : f32
      %12 = vector.broadcast %cst_10 : f32 to vector<256x64xf32>
      %c0_11 = arith.constant 0 : index
      %c0_12 = arith.constant 0 : index
      %13 = vector.load %arg7[%c0_11, %c0_12] : memref<256x64xf32, #tpu.memory_space<vmem>>, vector<256x64xf32>
      tpu.vector_store %arg7[%c0_11, %c0_12], %12 {strides = array<i32>} : memref<256x64xf32, #tpu.memory_space<vmem>>, vector<256x64xf32>,
    } else {
    }
    %c0 = arith.constant 0 : index
    %c0_1 = arith.constant 0 : index
    %3 = vector.load %arg7[%c0, %c0_1] : memref<256x64xf32, #tpu.memory_space<vmem>>, vector<256x64xf32>
    %c0_2 = arith.constant 0 : index
    %c0_3 = arith.constant 0 : index
    %4 = vector.load %arg3[%c0_2, %c0_3] : memref<256x147xbf16, #tpu.memory_space<vmem>>, vector<256x147xbf16>
    %c0_4 = arith.constant 0 : index
    %c0_5 = arith.constant 0 : index
    %5 = vector.load %arg4[%c0_4, %c0_5] : memref<147x64xbf16, #tpu.memory_space<vmem>>, vector<147x64xbf16>
    %cst = arith.constant dense<0.000000e+00> : vector<256x64xf32>
    %6 = tpu.matmul %4, %5, %cst {dimension_numbers = #tpu.dot_dimension_numbers<[1], [0], [0], [1], [0, 0, 1, 1], [], []>} : vector<256x147xbf16>, vector<147x64xbf16>, vector<256x64xf32> -> vector<256x64xf32>
    %7 = arith.addf %3, %6 : vector<256x64xf32>
    %c0_6 = arith.constant 0 : index
    %c0_7 = arith.constant 0 : index
    %8 = vector.load %arg7[%c0_6, %c0_7] : memref<256x64xf32, #tpu.memory_space<vmem>>, vector<256x64xf32>
    tpu.vector_store %arg7[%c0_6, %c0_7], %7 {strides = array<i32>} : memref<256x64xf32, #tpu.memory_space<vmem>>, vector<256x64xf32>,
    %c0_i32_8 = arith.constant 0 : i32
    %9 = arith.cmpi eq, %arg2, %c0_i32_8 : i32
    %10 = arith.extui %9 : i1 to i32
    %c0_i32_9 = arith.constant 0 : i32
    %11 = arith.cmpi ne, %10, %c0_i32_9 : i32
    scf.if %11 {
      %c0_10 = arith.constant 0 : index
      %c0_11 = arith.constant 0 : index
      %12 = vector.load %arg7[%c0_10, %c0_11] : memref<256x64xf32, #tpu.memory_space<vmem>>, vector<256x64xf32>
      %c0_12 = arith.constant 0 : index
      %c0_13 = arith.constant 0 : index
      %13 = vector.load %arg5[%c0_12, %c0_13] : memref<1x64xf32, #tpu.memory_space<vmem>>, vector<1x64xf32>
      %14 = vector.broadcast %13 : vector<1x64xf32> to vector<256x64xf32>
      %15 = arith.addf %12, %14 : vector<256x64xf32>
      %cst_14 = arith.constant 0.000000e+00 : f32
      %16 = vector.broadcast %cst_14 : f32 to vector<256x64xf32>
      %17 = arith.maximumf %15, %16 : vector<256x64xf32>
      %18 = arith.truncf %17 : vector<256x64xf32> to vector<256x64xbf16>
      %c0_15 = arith.constant 0 : index
      %c0_16 = arith.constant 0 : index
      %19 = vector.load %arg6[%c0_15, %c0_16] : memref<256x64xbf16, #tpu.memory_space<vmem>>, vector<256x64xbf16>
      tpu.vector_store %arg6[%c0_15, %c0_16], %18 {strides = array<i32>} : memref<256x64xbf16, #tpu.memory_space<vmem>>, vector<256x64xbf16>,
    } else {
    }
    return
  }
  func.func @transform_0(%arg0: i32, %arg1: i32, %arg2: i32) -> (i32, i32) {
    %c0_i32 = arith.constant 0 : i32
    return %arg0, %arg2 : i32, i32
  }
  func.func @transform_1(%arg0: i32, %arg1: i32, %arg2: i32) -> (i32, i32) {
    %c0_i32 = arith.constant 0 : i32
    return %arg2, %arg1 : i32, i32
  }
  func.func @transform_2(%arg0: i32, %arg1: i32, %arg2: i32) -> (i32, i32) {
    %c0_i32 = arith.constant 0 : i32
    %c0_i32_0 = arith.constant 0 : i32
    return %c0_i32, %arg1 : i32, i32
  }
  func.func @transform_3(%arg0: i32, %arg1: i32, %arg2: i32) -> (i32, i32) {
    %c0_i32 = arith.constant 0 : i32
    return %arg0, %arg1 : i32, i32
  }
}

</mosaic_0001>

<bundles_post_ra>
// kernel: conv_bn.1
= control target key start
LH: loop header
LB: loop body
LE: loop exit
PB: predicated region body
PF: predicated region fallthrough
CT: control target
= control target key end

     0   :  { %8 = vsyncpa [#allocation4], 0  ;;  %s2032_s0 = inlined_call_operand.vmem [shape: bf16[2048,147], index: 0, kind: input, shape index: {}]   ;;  %s2033_s1 = inlined_call_operand.vmem [shape: bf16[147,64], index: 1, kind: input, shape index: {}]   ;;  %s2034_s2 = inlined_call_operand.vmem [shape: f32[1,64], index: 2, kind: input, shape index: {}]   ;;  %s2035_s3 = inlined_call_operand.hbm [shape: bf16[2048,64], index: 3, kind: output, shape index: {}]  }
   0x1   :  { %10 = vsyncpa [#allocation4 + $0x1], 0  ;;  %s1641_s12 = smov 0   ;;  %s1643_s13 = smov 0  }
   0x2   :  { %s1645_s14 = smov 0   ;;  %s1647_s15 = smov 0  }
   0x3   :  { %s1649_s16 = smov 0   ;;  %s1651_s17 = smov 0  }
   0x4 LB: > { %s1256_s18 = sadd.s32 4294967295, %s1613_s17   ;;  %s1257_s19 = sadd.s32 4294967294, %s1613_s17   ;;  %s1613_s17 = sphi %s1651_s17, %s16_s17   ;;  %s1609_s16 = sphi %s1649_s16, %s2042_s16   ;;  %s1605_s15 = sphi %s1647_s15, %s2041_s15   ;;  %s1601_s14 = sphi %s1645_s14, %s2040_s14   ;;  %s1597_s13 = sphi %s1643_s13, %s2039_s13   ;;  %s1593_s12 = sphi %s1641_s12, %s2038_s12  }
   0x5   : > { %s35_s20 = sadd.s32 1, %s1609_s16  ;;  %s126_s21 = sadd.s32 1, %s1601_s14 }
   0x6   : > { %p37_p0 = scmp.ge.s32.totalorder %s35_s20, 8  ;;  %p136_p1 = scmp.ne.s32.totalorder %s1601_s14, %s1597_s13 }
   0x7   : > { %p137_p2 = scmp.eq.s32.totalorder %s1256_s18, 7  ;;  %p142_p3 = scmp.ne.s32.totalorder %s1597_s13, %s1593_s12 }
   0x8   : > { %s2044_s20 = smov (%p37_p0, %s35_s20), 0  ;;  %p143_p5 = scmp.eq.s32.totalorder %s1257_s19, 7 }
   0x9   : > { %p1681_p4 = por %p137_p2, %p136_p1  ;;  %s121_s23 = ssub.s32 %s1609_s16, %s2044_s20 }
   0xa   : > { %p1262_p6 = scmp.ge.s32.totalorder %s1613_s17, 1  ;;  %p124_p7 = scmp.eq.s32.totalorder %s121_s23, 0 }
   0xb   : > { %p1688_p8 = por %p143_p5, %p142_p3  ;;  %p194_p9 = scmp.lt.s32.totalorder %s1613_s17, 9 }
   0xc   : > { %s1694_s25 = scalar_select %p124_p7, %s1601_s14, %s126_s21  }
   0xd   : > { %p195_p10 = pnand %p1262_p6, %p194_p9 }
   0xe   : > { %v1477_v0 = vld [vmem:[%s2033_s1] sm:$0xff] (!%p195_p10)   ;;  %v1615_v1 = vmov (!%p195_p10), 0   ;;  %v1478_v2 = vld [vmem:[%s2033_s1 + $0x8] sm:$0xff] (!%p195_p10)   ;;  %v1479_v3 = vld [vmem:[%s2033_s1 + $0x10] sm:$0xff] (!%p195_p10)   ;;  %s1264_s5 = sshll.u32 (!%p195_p10), %s1605_s15, 5  ;;  %vm264_vm0 = vcmask (!%p195_p10), 523264  }
   0xf   : > { %198 = sbr.rel (%p195_p10) target bundleno = 359 (0x167), region = 32  ;;  %637 = vmatprep.subr.bf16.mxu0 (!%p195_p10), %v1615_v1  ;;  %1397 = vmatprep.subr.bf16.mxu1 (!%p195_p10), %v1615_v1  ;;  %p236_p11 = scmp.lt.s32.totalorder (!%p195_p10), %s1264_s5, 255  ;;  %v1480_v4 = vld [vmem:[%s2033_s1 + $0x18] sm:$0xff] (!%p195_p10)   ;;  %v1616_v5 = vmov (!%p195_p10), 0.0   ;;  %v1481_v6 = vld [vmem:[%s2033_s1 + $0x20] sm:$0xff] (!%p195_p10)   ;;  %vm581_vm1 = vcmask (!%p195_p10), 154624  }
  0x10   : > { %638 = vmatpush1.bf16.msra.mxu0 (!%p195_p10), %v1477_v0  ;;  %1407 = vmatpush1.bf16.msra.mxu1 (!%p195_p10), %v1477_v0  ;;  %265 = vst.msk [vmem:[#allocation2] sm:$0xff] (!%p195_p10), %vm264_vm0, %v1616_v5  ;;  %266 = vst.msk [vmem:[#allocation2 + $0x8] sm:$0xff] (!%p195_p10), %vm264_vm0, %v1616_v5  ;;  %v1482_v9 = vld [vmem:[%s2033_s1 + $0x28] sm:$0xff] (!%p195_p10)   ;;  %v1483_v10 = vld [vmem:[%s2033_s1 + $0x30] sm:$0xff] (!%p195_p10)   ;;  %vm630_vm2 = vcmask (!%p195_p10), 1040384   ;;  %vm631_vm3 = vcmask (!%p195_p10), 1041408  }
  0x11   : > { %639 = vmatprep.subr.bf16.mxu0 (!%p195_p10), %v1615_v1  ;;  %1398 = vmatprep.subr.bf16.mxu1 (!%p195_p10), %v1615_v1  ;;  %267 = vst.msk [vmem:[#allocation2 + $0x10] sm:$0xff] (!%p195_p10), %vm264_vm0, %v1616_v5  ;;  %268 = vst.msk [vmem:[#allocation2 + $0x18] sm:$0xff] (!%p195_p10), %vm264_vm0, %v1616_v5  ;;  %v1484_v11 = vld [vmem:[%s2033_s1 + $0x38] sm:$0xff] (!%p195_p10)   ;;  %v1617_v12 = vmov (!%p195_p10), 65535   ;;  %v1485_v14 = vld [vmem:[%s2033_s1 + $0x40] sm:$0xff] (!%p195_p10)   ;;  %s231_s7 = sand.u32 (!%p195_p10), 1, %s1597_s13  }
  0x12   : > { %269 = vst.msk [vmem:[#allocation2 + $0x20] sm:$0xff] (!%p195_p10), %vm264_vm0, %v1616_v5  ;;  %270 = vst.msk [vmem:[#allocation2 + $0x28] sm:$0xff] (!%p195_p10), %vm264_vm0, %v1616_v5  ;;  %v632_v13 = vsel (!%p195_p10), %vm630_vm2, 4294967295, %v1617_v12  ;;  %v1486_v15 = vld [vmem:[%s2033_s1 + $0x48] ss:$0 sps:$4 sm:$0x33] (!%p195_p10)  }
  0x13   : > { %271 = vst.msk [vmem:[#allocation2 + $0x30] sm:$0xff] (!%p195_p10), %vm264_vm0, %v1616_v5  ;;  %272 = vst.msk [vmem:[#allocation2 + $0x38] sm:$0xff] (!%p195_p10), %vm264_vm0, %v1616_v5  ;;  %v633_v16 = vsel (!%p195_p10), %vm631_vm3, %v632_v13, 0  ;;  %s1263_s10 = sshll.u32 (!%p195_p10), %s231_s7, 7  ;;  %vm1097_vm4 = vcmask (!%p195_p10), 519168   ;;  %s1396_s18 = sshll.u32 (!%p195_p10), %s1605_s15, 11 }
  0x14   : > { %640 = vmatpush1.bf16.msra.mxu0 (!%p195_p10), %v1478_v2  ;;  %1408 = vmatpush1.bf16.msra.mxu1 (!%p195_p10), %v1478_v2  ;;  %273 = vst.msk [vmem:[#allocation2 + $0x40] sm:$0xff] (!%p195_p10), %vm264_vm0, %v1616_v5  ;;  %274 = vst.msk [vmem:[#allocation2 + $0x48] sm:$0xff] (!%p195_p10), %vm264_vm0, %v1616_v5  ;;  %v635_v17 = vand.u32 (!%p195_p10), %v1486_v15, %v633_v16  ;;  %v1845_v2 = vld [vmem:[%s2034_s2] ss:$0 sm:$0xff] (!%p195_p10)  ;;  %s1972_s26 = scalar_lea.hbm (!%p195_p10), %s2035_s3, %s1396_s18  ;;  %s1986_s15 = scalar_lea.sflag (!%p195_p10), [#allocation4], %s231_s7 }
  0x15   : > { %641 = vmatprep.subr.bf16.mxu0 (!%p195_p10), %v1615_v1  ;;  %1399 = vmatprep.subr.bf16.mxu1 (!%p195_p10), %v1615_v1  ;;  %275 = vst.msk [vmem:[#allocation2 + $0x50] sm:$0xff] (!%p195_p10), %vm264_vm0, %v1616_v5  ;;  %276 = vst.msk [vmem:[#allocation2 + $0x58] sm:$0xff] (!%p195_p10), %vm264_vm0, %v1616_v5  ;;  %s1618_s28 = smov (!%p195_p10), [#allocation3]  }
  0x16   : > { %s2046_s5 = smov (!%p236_p11, %s1264_s5), 255  ;;  %277 = vst.msk [vmem:[#allocation2 + $0x60] sm:$0xff] %vm264_vm0, %v1616_v5  ;;  %278 = vst.msk [vmem:[#allocation2 + $0x68] sm:$0xff] %vm264_vm0, %v1616_v5  ;;  %s1539_s29 = sshll.u32 %s1618_s28, 4  ;;  %s1540_s29 = int_to_ptr.vmem [resolvable:$false] %s1539_s29 }
  0x17   : > { %s1363_s8 = sshll.u32 %s2046_s5, 3  ;;  %279 = vst.msk [vmem:[#allocation2 + $0x70] sm:$0xff] %vm264_vm0, %v1616_v5  ;;  %280 = vst.msk [vmem:[#allocation2 + $0x78] sm:$0xff] %vm264_vm0, %v1616_v5  ;;  %v297_v48 = vld [vmem:[#allocation2] sm:$0xff]  ;;  %v298_v52 = vld [vmem:[#allocation2 + $0x8] sm:$0xff]  ;;  %s1541_s30 = scalar_lea.vmem %s1540_s29, 4096 }
  0x18   : > { %642 = vmatpush1.bf16.msra.mxu0 %v1479_v3  ;;  %1409 = vmatpush1.bf16.msra.mxu1 %v1479_v3  ;;  %281 = vst.msk [vmem:[#allocation2 + $0x80] sm:$0xff] %vm264_vm0, %v1616_v5  ;;  %282 = vst.msk [vmem:[#allocation2 + $0x88] sm:$0xff] %vm264_vm0, %v1616_v5  ;;  %s1757_s11 = scalar_lea.vmem %s2032_s0, %s1363_s8  ;;  %v299_v0 = vld [vmem:[#allocation2 + $0x10] sm:$0xff] }
  0x19   : > { %643 = vmatprep.subr.bf16.mxu0 %v1615_v1  ;;  %1400 = vmatprep.subr.bf16.mxu1 %v1615_v1  ;;  %283 = vst.msk [vmem:[#allocation2 + $0x90] sm:$0xff] %vm264_vm0, %v1616_v5  ;;  %284 = vst.msk [vmem:[#allocation2 + $0x98] sm:$0xff] %vm264_vm0, %v1616_v5  ;;  %v1489_v7 = vld [vmem:[%s1757_s11 + $0x4] ss:$8 sps:$4 sm:$0xff]   ;;  %v1487_v18 = vld [vmem:[%s1757_s11] ss:$8 sps:$4 sm:$0xff]  }
  0x1a   : > { %285 = vst.msk [vmem:[#allocation2 + $0xa0] sm:$0xff] %vm264_vm0, %v1616_v5  ;;  %286 = vst.msk [vmem:[#allocation2 + $0xa8] sm:$0xff] %vm264_vm0, %v1616_v5  ;;  %v1492_v8 = vld [vmem:[%s1757_s11 + $0x84] ss:$8 sps:$4 sm:$0xff]   ;;  %1309 = vmatprep.mubr.msk.bf16.mxu0 %vm581_vm1, %v1489_v7  ;;  %v1490_v19 = vld [vmem:[%s1757_s11 + $0x80] ss:$8 sps:$4 sm:$0xff]  }
  0x1b   : > { %287 = vst.msk [vmem:[#allocation2 + $0xb0] sm:$0xff] %vm264_vm0, %v1616_v5  ;;  %288 = vst.msk [vmem:[#allocation2 + $0xb8] sm:$0xff] %vm264_vm0, %v1616_v5  ;;  %1317 = vmatprep.mubr.msk.bf16.mxu1 %vm581_vm1, %v1492_v8  ;;  %v1493_v20 = vld [vmem:[%s1757_s11 + $0x14] ss:$8 sps:$4 sm:$0xff]   ;;  %v1497_v22 = vld [vmem:[%s1757_s11 + $0x10] ss:$8 sps:$4 sm:$0xff]  }
  0x1c   : > { %289 = vst.msk [vmem:[#allocation2 + $0xc0] sm:$0xff] %vm264_vm0, %v1616_v5  ;;  %290 = vst.msk [vmem:[#allocation2 + $0xc8] sm:$0xff] %vm264_vm0, %v1616_v5  ;;  %644 = vmatpush1.bf16.msra.mxu0 %v1480_v4  ;;  %1410 = vmatpush1.bf16.msra.mxu1 %v1480_v4  ;;  %v1495_v21 = vld [vmem:[%s1757_s11 + $0x94] ss:$8 sps:$4 sm:$0xff]   ;;  %v1498_v23 = vld [vmem:[%s1757_s11 + $0x90] ss:$8 sps:$4 sm:$0xff]  }
  0x1d   : > { %291 = vst.msk [vmem:[#allocation2 + $0xd0] sm:$0xff] %vm264_vm0, %v1616_v5  ;;  %292 = vst.msk [vmem:[#allocation2 + $0xd8] sm:$0xff] %vm264_vm0, %v1616_v5  ;;  %645 = vmatprep.subr.bf16.mxu0 %v1615_v1  ;;  %1401 = vmatprep.subr.bf16.mxu1 %v1615_v1  ;;  %v1499_v24 = vld [vmem:[%s1757_s11 + $0x24] ss:$8 sps:$4 sm:$0xff]   ;;  %v1503_v26 = vld [vmem:[%s1757_s11 + $0x20] ss:$8 sps:$4 sm:$0xff]  }
  0x1e   : > { %293 = vst.msk [vmem:[#allocation2 + $0xe0] sm:$0xff] %vm264_vm0, %v1616_v5  ;;  %294 = vst.msk [vmem:[#allocation2 + $0xe8] sm:$0xff] %vm264_vm0, %v1616_v5  ;;  %v1501_v25 = vld [vmem:[%s1757_s11 + $0xa4] ss:$8 sps:$4 sm:$0xff]   ;;  %v1504_v27 = vld [vmem:[%s1757_s11 + $0xa0] ss:$8 sps:$4 sm:$0xff]  }
  0x1f   : > { %295 = vst.msk [vmem:[#allocation2 + $0xf0] sm:$0xff] %vm264_vm0, %v1616_v5  ;;  %296 = vst.msk [vmem:[#allocation2 + $0xf8] sm:$0xff] %vm264_vm0, %v1616_v5  ;;  %v1505_v28 = vld [vmem:[%s1757_s11 + $0x34] ss:$8 sps:$4 sm:$0xff]   ;;  %v1509_v30 = vld [vmem:[%s1757_s11 + $0x30] ss:$8 sps:$4 sm:$0xff]  }
  0x20   : > { %646 = vmatpush1.bf16.msra.mxu0 %v1481_v6  ;;  %1411 = vmatpush1.bf16.msra.mxu1 %v1481_v6  ;;  %v1507_v29 = vld [vmem:[%s1757_s11 + $0xb4] ss:$8 sps:$4 sm:$0xff]   ;;  %v1510_v31 = vld [vmem:[%s1757_s11 + $0xb0] ss:$8 sps:$4 sm:$0xff]   ;;  %v1511_v32 = vld [vmem:[%s1757_s11 + $0x44] ss:$8 sps:$4 sm:$0xff]  }
  0x21   : > { %647 = vmatprep.subr.bf16.mxu0 %v1615_v1  ;;  %1402 = vmatprep.subr.bf16.mxu1 %v1615_v1  ;;  %v1513_v33 = vld [vmem:[%s1757_s11 + $0xc4] ss:$8 sps:$4 sm:$0xff]   ;;  %v1515_v34 = vld [vmem:[%s1757_s11 + $0x40] ss:$8 sps:$4 sm:$0xff]   ;;  %v1517_v36 = vld [vmem:[%s1757_s11 + $0x54] ss:$8 sps:$4 sm:$0xff]  }
  0x22   : > { %v1516_v35 = vld [vmem:[%s1757_s11 + $0xc0] ss:$8 sps:$4 sm:$0xff]   ;;  %v1519_v37 = vld [vmem:[%s1757_s11 + $0xd4] ss:$8 sps:$4 sm:$0xff]   ;;  %v1521_v38 = vld [vmem:[%s1757_s11 + $0x50] ss:$8 sps:$4 sm:$0xff]  }
  0x23   : > { %v1522_v39 = vld [vmem:[%s1757_s11 + $0xd0] ss:$8 sps:$4 sm:$0xff]   ;;  %v1523_v40 = vld [vmem:[%s1757_s11 + $0x64] ss:$8 sps:$4 sm:$0xff]   ;;  %v1527_v42 = vld [vmem:[%s1757_s11 + $0x60] ss:$8 sps:$4 sm:$0xff]  }
  0x24   : > { %648 = vmatpush1.bf16.msra.mxu0 %v1482_v9  ;;  %1412 = vmatpush1.bf16.msra.mxu1 %v1482_v9  ;;  %v1525_v41 = vld [vmem:[%s1757_s11 + $0xe4] ss:$8 sps:$4 sm:$0xff]   ;;  %v1528_v43 = vld [vmem:[%s1757_s11 + $0xe0] ss:$8 sps:$4 sm:$0xff]   ;;  %v1529_v44 = vld [vmem:[%s1757_s11 + $0x74] ss:$8 sps:$4 sm:$0xff]  }
  0x25   : > { %649 = vmatprep.subr.bf16.mxu0 %v1615_v1  ;;  %1403 = vmatprep.subr.bf16.mxu1 %v1615_v1  ;;  %v1531_v45 = vld [vmem:[%s1757_s11 + $0xf4] ss:$8 sps:$4 sm:$0xff]   ;;  %v1533_v46 = vld [vmem:[%s1757_s11 + $0x70] ss:$8 sps:$4 sm:$0xff]   ;;  %v313_v49 = vld [vmem:[#allocation2 + $0x80] sm:$0xff] }
  0x26   : > { %v1534_v47 = vld [vmem:[%s1757_s11 + $0xf0] ss:$8 sps:$4 sm:$0xff]   ;;  %v314_v53 = vld [vmem:[#allocation2 + $0x88] sm:$0xff]  ;;  %s1857_s11 = scalar_lea.vmem [#allocation3], %s1263_s10 }
  0x27   : > { %v300_v5 = vld [vmem:[#allocation2 + $0x18] sm:$0xff]  ;;  %s1145_s19 = sshll.u32 %s1857_s11, 4  ;;  %s1974_s19 = int_to_ptr.vmem [resolvable:$true] %s1145_s19 }
  0x28   : > { %650 = vmatpush1.bf16.msra.mxu0 %v1483_v10  ;;  %1413 = vmatpush1.bf16.msra.mxu1 %v1483_v10  ;;  %v316_v6 = vld [vmem:[#allocation2 + $0x98] sm:$0xff]  ;;  %s1535_s27 = scalar_lea.vmem %s1974_s19, 2048  ;;  %p1542_p1 = scmp.lt.s32.totalorder %s1974_s19, %s1540_s29 }
  0x29   : > { %651 = vmatprep.subr.bf16.mxu0 %v1615_v1  ;;  %1404 = vmatprep.subr.bf16.mxu1 %v1615_v1  ;;  %p1536_p12 = scmp.ne.s32.totalorder %s1974_s19, %s1535_s27  ;;  %p1543_p2 = scmp.lt.s32.totalorder %s1541_s30, %s1535_s27 }
  0x2b   : > { %p1537_p13 = pnand %p1536_p12, %p1681_p4  ;;  %p1544_p3 = por %p1543_p2, %p1542_p1 }
  0x2c   : > { %652 = vmatpush1.bf16.msra.mxu0 %v1484_v11  ;;  %1414 = vmatpush1.bf16.msra.mxu1 %v1484_v11 }
  0x2d   : > { %653 = vmatprep.subr.bf16.mxu0 %v1615_v1  ;;  %1405 = vmatprep.subr.bf16.mxu1 %v1615_v1  ;;  %p1538_p0 = pneg %p1537_p13 }
  0x2f   : > { %p1545_p5 = pnand %p1544_p3, %p1538_p0 }
  0x30   : > { %654 = vmatpush1.bf16.msra.mxu0 %v1485_v14  ;;  %1415 = vmatpush1.bf16.msra.mxu1 %v1485_v14 }
  0x31   : > { %655 = vmatprep.subr.bf16.mxu0 %v1615_v1  ;;  %1406 = vmatprep.subr.bf16.mxu1 %v1615_v1  ;;  %v315_v1 = vld [vmem:[#allocation2 + $0x90] sm:$0xff] }
  0x34   : > { %656 = vmatpush1.bf16.msra.mxu0 %v635_v17  ;;  %1416 = vmatpush1.bf16.msra.mxu1 %v635_v17 }
  0x37   : > { %670 = vmatmul.mubr.bf16.vlgmr.msra.gmra.mrb[0].mxu0 %v1487_v18  ;;  %734 = vmatmul.mubr.bf16.vlgmr.msra.gmra.mrb[0].mxu1 %v1490_v19 }
  0x38   : > { %1310 = vmatprep.mubr.msk.bf16.mxu0 %vm581_vm1, %v1493_v20  ;;  %1318 = vmatprep.mubr.msk.bf16.mxu1 %vm581_vm1, %v1495_v21 }
  0x3f   : > { %678 = vmatmul.mubr.bf16.gmra.mrb[4].mxu0 %v1497_v22  ;;  %742 = vmatmul.mubr.bf16.gmra.mrb[4].mxu1 %v1498_v23 }
  0x40   : > { %1311 = vmatprep.mubr.msk.bf16.mxu0 %vm581_vm1, %v1499_v24  ;;  %1319 = vmatprep.mubr.msk.bf16.mxu1 %vm581_vm1, %v1501_v25 }
  0x47   : > { %686 = vmatmul.mubr.bf16.gmra.mrb[8].mxu0 %v1503_v26  ;;  %750 = vmatmul.mubr.bf16.gmra.mrb[8].mxu1 %v1504_v27  ;;  %v301_v27 = vld [vmem:[#allocation2 + $0x20] sm:$0xff] }
  0x48   : > { %1312 = vmatprep.mubr.msk.bf16.mxu0 %vm581_vm1, %v1505_v28  ;;  %1320 = vmatprep.mubr.msk.bf16.mxu1 %vm581_vm1, %v1507_v29  ;;  %v317_v28 = vld [vmem:[#allocation2 + $0xa0] sm:$0xff] }
  0x4f   : > { %694 = vmatmul.mubr.bf16.gmra.mrb[12].mxu0 %v1509_v30  ;;  %758 = vmatmul.mubr.bf16.gmra.mrb[12].mxu1 %v1510_v31 }
  0x50   : > { %1313 = vmatprep.mubr.msk.bf16.mxu0 %vm581_vm1, %v1511_v32  ;;  %1321 = vmatprep.mubr.msk.bf16.mxu1 %vm581_vm1, %v1513_v33 }
  0x57   : > { %702 = vmatmul.mubr.bf16.gmra.mrb[16].mxu0 %v1515_v34  ;;  %766 = vmatmul.mubr.bf16.gmra.mrb[16].mxu1 %v1516_v35  ;;  %v302_v35 = vld [vmem:[#allocation2 + $0x28] sm:$0xff] }
  0x58   : > { %1314 = vmatprep.mubr.msk.bf16.mxu0 %vm581_vm1, %v1517_v36  ;;  %1322 = vmatprep.mubr.msk.bf16.mxu1 %vm581_vm1, %v1519_v37  ;;  %v318_v36 = vld [vmem:[#allocation2 + $0xa8] sm:$0xff] }
  0x5f   : > { %710 = vmatmul.mubr.bf16.gmra.mrb[20].mxu0 %v1521_v38  ;;  %774 = vmatmul.mubr.bf16.gmra.mrb[20].mxu1 %v1522_v39 }
  0x60   : > { %1315 = vmatprep.mubr.msk.bf16.mxu0 %vm581_vm1, %v1523_v40  ;;  %1323 = vmatprep.mubr.msk.bf16.mxu1 %vm581_vm1, %v1525_v41 }
  0x67   : > { %718 = vmatmul.mubr.bf16.gmra.mrb[24].mxu0 %v1527_v42  ;;  %782 = vmatmul.mubr.bf16.gmra.mrb[24].mxu1 %v1528_v43 }
  0x68   : > { %1316 = vmatprep.mubr.msk.bf16.mxu0 %vm581_vm1, %v1529_v44  ;;  %1324 = vmatprep.mubr.msk.bf16.mxu1 %vm581_vm1, %v1531_v45 }
  0x6f   : > { %726 = vmatmul.mubr.bf16.gmra.mrb[28].mxu0 %v1533_v46  ;;  %790 = vmatmul.mubr.bf16.gmra.mrb[28].mxu1 %v1534_v47 }
 0x10a   : > { %v671_v50 = vpop.f32.mrb[0].mxu0  ;;  %v735_v51 = vpop.f32.mrb[0].mxu1 }
 0x10b   : > { %v798_v54 = vadd.f32 %v671_v50, %v297_v48  ;;  %v814_v55 = vadd.f32 %v735_v51, %v313_v49  ;;  %v673_v56 = vpop.f32.mrb[1].mxu0  ;;  %v737_v57 = vpop.f32.mrb[1].mxu1 }
 0x10c   : > { %v674_v58 = vpop.f32.mrb[2].mxu0  ;;  %v738_v59 = vpop.f32.mrb[2].mxu1 }
 0x10d   : > { %831 = vst.msk [vmem:[#allocation2] sm:$0xff] %vm264_vm0, %v798_v54  ;;  %847 = vst.msk [vmem:[#allocation2 + $0x80] sm:$0xff] %vm264_vm0, %v814_v55  ;;  %v799_v60 = vadd.f32 %v674_v58, %v298_v52  ;;  %v815_v61 = vadd.f32 %v738_v59, %v314_v53  ;;  %v676_v62 = vpop.f32.mrb[3].mxu0  ;;  %v740_v63 = vpop.f32.mrb[3].mxu1  ;;  %v303_v59 = vld [vmem:[#allocation2 + $0x30] sm:$0xff] }
 0x10f   : > { %832 = vst.msk [vmem:[#allocation2 + $0x8] sm:$0xff] %vm264_vm0, %v799_v60  ;;  %848 = vst.msk [vmem:[#allocation2 + $0x88] sm:$0xff] %vm264_vm0, %v815_v61  ;;  %v319_v60 = vld [vmem:[#allocation2 + $0xb0] sm:$0xff] }
 0x112   : > { %v679_v3 = vpop.f32.mrb[4].mxu0  ;;  %v743_v4 = vpop.f32.mrb[4].mxu1 }
 0x113   : > { %v800_v7 = vadd.f32 %v679_v3, %v299_v0  ;;  %v816_v8 = vadd.f32 %v743_v4, %v315_v1  ;;  %v681_v9 = vpop.f32.mrb[5].mxu0  ;;  %v745_v10 = vpop.f32.mrb[5].mxu1  ;;  %v304_v4 = vld [vmem:[#allocation2 + $0x38] sm:$0xff] }
 0x114   : > { %v866_v11 = vld [vmem:[#allocation2] sm:$0xff]  ;;  %v682_v13 = vpop.f32.mrb[6].mxu0  ;;  %v746_v14 = vpop.f32.mrb[6].mxu1 }
 0x115   : > { %v882_v12 = vld [vmem:[#allocation2 + $0x80] sm:$0xff]  ;;  %v905_v15 = vadd.f32 %v1845_v2, %v866_v11  ;;  %833 = vst.msk [vmem:[#allocation2 + $0x10] sm:$0xff] %vm264_vm0, %v800_v7  ;;  %849 = vst.msk [vmem:[#allocation2 + $0x90] sm:$0xff] %vm264_vm0, %v816_v8  ;;  %v801_v17 = vadd.f32 %v682_v13, %v300_v5  ;;  %v817_v18 = vadd.f32 %v746_v14, %v316_v6  ;;  %v684_v19 = vpop.f32.mrb[7].mxu0  ;;  %v748_v20 = vpop.f32.mrb[7].mxu1  ;;  %v320_v5 = vld [vmem:[#allocation2 + $0xb8] sm:$0xff] }
 0x116   : > { %v921_v16 = vadd.f32 %v1845_v2, %v882_v12  ;;  %v867_v21 = vld [vmem:[#allocation2 + $0x8] sm:$0xff] }
 0x117   : > { %v883_v22 = vld [vmem:[#allocation2 + $0x88] sm:$0xff]  ;;  %v937_v23 = vmax.f32 %v905_v15, 0.0  ;;  %v906_v25 = vadd.f32 %v1845_v2, %v867_v21  ;;  %834 = vst.msk [vmem:[#allocation2 + $0x18] sm:$0xff] %vm264_vm0, %v801_v17  ;;  %850 = vst.msk [vmem:[#allocation2 + $0x98] sm:$0xff] %vm264_vm0, %v817_v18 }
 0x118   : > { %v953_v24 = vmax.f32 %v921_v16, 0.0  ;;  %v922_v26 = vadd.f32 %v1845_v2, %v883_v22 }
 0x119   : > { %v1364_v29 = vpack.c.bf16 %v937_v23, %v937_v23  ;;  %v938_v31 = vmax.f32 %v906_v25, 0.0 }
 0x11a   : > { %v1380_v30 = vpack.c.bf16 %v953_v24, %v953_v24  ;;  %v954_v32 = vmax.f32 %v922_v26, 0.0  ;;  %v687_v33 = vpop.f32.mrb[8].mxu0  ;;  %v751_v34 = vpop.f32.mrb[8].mxu1 }
 0x11b   : > { %1098 = vst.msk [vmem:[%s1857_s11] sm:$0xf] %vm1097_vm4, %v1364_v29  ;;  %v1365_v37 = vpack.c.bf16 %v938_v31, %v938_v31  ;;  %v802_v39 = vadd.f32 %v687_v33, %v301_v27  ;;  %v818_v40 = vadd.f32 %v751_v34, %v317_v28  ;;  %v689_v41 = vpop.f32.mrb[9].mxu0  ;;  %v753_v42 = vpop.f32.mrb[9].mxu1  ;;  %v305_v28 = vld [vmem:[#allocation2 + $0x40] sm:$0xff] }
 0x11c   : > { %1114 = vst.msk [vmem:[%s1857_s11 + $0x40] sm:$0xf] %vm1097_vm4, %v1380_v30  ;;  %v1381_v38 = vpack.c.bf16 %v954_v32, %v954_v32  ;;  %v868_v43 = vld [vmem:[#allocation2 + $0x10] sm:$0xff]  ;;  %v690_v45 = vpop.f32.mrb[10].mxu0  ;;  %v754_v46 = vpop.f32.mrb[10].mxu1  ;;  %v321_v29 = vld [vmem:[#allocation2 + $0xc0] sm:$0xff] }
 0x11d   : > { %v884_v44 = vld [vmem:[#allocation2 + $0x90] sm:$0xff]  ;;  %1099 = vst.msk [vmem:[%s1857_s11 + $0x4] sm:$0xf] %vm1097_vm4, %v1365_v37  ;;  %v907_v47 = vadd.f32 %v1845_v2, %v868_v43  ;;  %v803_v49 = vadd.f32 %v690_v45, %v302_v35  ;;  %v819_v50 = vadd.f32 %v754_v46, %v318_v36  ;;  %v692_v51 = vpop.f32.mrb[11].mxu0  ;;  %v756_v52 = vpop.f32.mrb[11].mxu1  ;;  %v306_v36 = vld [vmem:[#allocation2 + $0x48] sm:$0xff] }
 0x11e   : > { %1115 = vst.msk [vmem:[%s1857_s11 + $0x44] sm:$0xf] %vm1097_vm4, %v1381_v38  ;;  %v923_v48 = vadd.f32 %v1845_v2, %v884_v44  ;;  %v869_v53 = vld [vmem:[#allocation2 + $0x18] sm:$0xff]  ;;  %v322_v37 = vld [vmem:[#allocation2 + $0xc8] sm:$0xff] }
 0x11f   : > { %835 = vst.msk [vmem:[#allocation2 + $0x20] sm:$0xff] %vm264_vm0, %v802_v39  ;;  %851 = vst.msk [vmem:[#allocation2 + $0xa0] sm:$0xff] %vm264_vm0, %v818_v40  ;;  %v885_v54 = vld [vmem:[#allocation2 + $0x98] sm:$0xff]  ;;  %v939_v55 = vmax.f32 %v907_v47, 0.0  ;;  %v908_v57 = vadd.f32 %v1845_v2, %v869_v53 }
 0x120   : > { %v955_v56 = vmax.f32 %v923_v48, 0.0  ;;  %v924_v58 = vadd.f32 %v1845_v2, %v885_v54  ;;  %836 = vst.msk [vmem:[#allocation2 + $0x28] sm:$0xff] %vm264_vm0, %v803_v49  ;;  %852 = vst.msk [vmem:[#allocation2 + $0xa8] sm:$0xff] %vm264_vm0, %v819_v50 }
 0x121   : > { %v1366_v61 = vpack.c.bf16 %v939_v55, %v939_v55  ;;  %v940_v63 = vmax.f32 %v908_v57, 0.0 }
 0x122   : > { %v1382_v62 = vpack.c.bf16 %v955_v56, %v955_v56  ;;  %v956_v0 = vmax.f32 %v924_v58, 0.0  ;;  %v695_v1 = vpop.f32.mrb[12].mxu0  ;;  %v759_v3 = vpop.f32.mrb[12].mxu1 }
 0x123   : > { %1100 = vst.msk [vmem:[%s1857_s11 + $0x8] sm:$0xf] %vm1097_vm4, %v1366_v61  ;;  %v1367_v6 = vpack.c.bf16 %v940_v63, %v940_v63  ;;  %v804_v8 = vadd.f32 %v695_v1, %v303_v59  ;;  %v820_v9 = vadd.f32 %v759_v3, %v319_v60  ;;  %v697_v10 = vpop.f32.mrb[13].mxu0  ;;  %v761_v11 = vpop.f32.mrb[13].mxu1  ;;  %v307_v60 = vld [vmem:[#allocation2 + $0x50] sm:$0xff] }
 0x124   : > { %1116 = vst.msk [vmem:[%s1857_s11 + $0x48] sm:$0xf] %vm1097_vm4, %v1382_v62  ;;  %v1383_v7 = vpack.c.bf16 %v956_v0, %v956_v0  ;;  %v698_v14 = vpop.f32.mrb[14].mxu0  ;;  %v762_v15 = vpop.f32.mrb[14].mxu1  ;;  %v323_v61 = vld [vmem:[#allocation2 + $0xd0] sm:$0xff] }
 0x125   : > { %1101 = vst.msk [vmem:[%s1857_s11 + $0xc] sm:$0xf] %vm1097_vm4, %v1367_v6  ;;  %v805_v18 = vadd.f32 %v698_v14, %v304_v4  ;;  %v821_v19 = vadd.f32 %v762_v15, %v320_v5  ;;  %v700_v20 = vpop.f32.mrb[15].mxu0  ;;  %v764_v21 = vpop.f32.mrb[15].mxu1  ;;  %v308_v5 = vld [vmem:[#allocation2 + $0x58] sm:$0xff] }
 0x126   : > { %v870_v12 = vld [vmem:[#allocation2 + $0x20] sm:$0xff]  ;;  %1117 = vst.msk [vmem:[%s1857_s11 + $0x4c] sm:$0xf] %vm1097_vm4, %v1383_v7  ;;  %v324_v6 = vld [vmem:[#allocation2 + $0xd8] sm:$0xff] }
 0x127   : > { %v886_v13 = vld [vmem:[#allocation2 + $0xa0] sm:$0xff]  ;;  %v909_v16 = vadd.f32 %v1845_v2, %v870_v12  ;;  %837 = vst.msk [vmem:[#allocation2 + $0x30] sm:$0xff] %vm264_vm0, %v804_v8  ;;  %853 = vst.msk [vmem:[#allocation2 + $0xb0] sm:$0xff] %vm264_vm0, %v820_v9  ;;  %v871_v22 = vld [vmem:[#allocation2 + $0x28] sm:$0xff] }
 0x128   : > { %v925_v17 = vadd.f32 %v1845_v2, %v886_v13  ;;  %v887_v23 = vld [vmem:[#allocation2 + $0xa8] sm:$0xff]  ;;  %v910_v26 = vadd.f32 %v1845_v2, %v871_v22  ;;  %838 = vst.msk [vmem:[#allocation2 + $0x38] sm:$0xff] %vm264_vm0, %v805_v18  ;;  %854 = vst.msk [vmem:[#allocation2 + $0xb8] sm:$0xff] %vm264_vm0, %v821_v19 }
 0x129   : > { %v941_v24 = vmax.f32 %v909_v16, 0.0  ;;  %v926_v27 = vadd.f32 %v1845_v2, %v887_v23 }
 0x12a   : > { %v957_v25 = vmax.f32 %v925_v17, 0.0  ;;  %v942_v32 = vmax.f32 %v910_v26, 0.0  ;;  %v703_v34 = vpop.f32.mrb[16].mxu0  ;;  %v767_v35 = vpop.f32.mrb[16].mxu1 }
 0x12b   : > { %v1368_v30 = vpack.c.bf16 %v941_v24, %v941_v24  ;;  %v958_v33 = vmax.f32 %v926_v27, 0.0  ;;  %v806_v40 = vadd.f32 %v703_v34, %v305_v28  ;;  %v822_v41 = vadd.f32 %v767_v35, %v321_v29  ;;  %v705_v42 = vpop.f32.mrb[17].mxu0  ;;  %v769_v43 = vpop.f32.mrb[17].mxu1  ;;  %v309_v29 = vld [vmem:[#allocation2 + $0x60] sm:$0xff] }
 0x12c   : > { %v1384_v31 = vpack.c.bf16 %v957_v25, %v957_v25  ;;  %v1369_v38 = vpack.c.bf16 %v942_v32, %v942_v32  ;;  %v706_v46 = vpop.f32.mrb[18].mxu0  ;;  %v770_v47 = vpop.f32.mrb[18].mxu1 }
 0x12d   : > { %1102 = vst.msk [vmem:[%s1857_s11 + $0x10] sm:$0xf] %vm1097_vm4, %v1368_v30  ;;  %v1385_v39 = vpack.c.bf16 %v958_v33, %v958_v33  ;;  %v807_v50 = vadd.f32 %v706_v46, %v306_v36  ;;  %v823_v51 = vadd.f32 %v770_v47, %v322_v37  ;;  %v708_v52 = vpop.f32.mrb[19].mxu0  ;;  %v772_v53 = vpop.f32.mrb[19].mxu1  ;;  %v325_v30 = vld [vmem:[#allocation2 + $0xe0] sm:$0xff]  ;;  %v310_v37 = vld [vmem:[#allocation2 + $0x68] sm:$0xff] }
 0x12e   : > { %1118 = vst.msk [vmem:[%s1857_s11 + $0x50] sm:$0xf] %vm1097_vm4, %v1384_v31  ;;  %v872_v44 = vld [vmem:[#allocation2 + $0x30] sm:$0xff]  ;;  %1103 = vst.msk [vmem:[%s1857_s11 + $0x14] sm:$0xf] %vm1097_vm4, %v1369_v38  ;;  %v326_v38 = vld [vmem:[#allocation2 + $0xe8] sm:$0xff] }
 0x12f   : > { %v888_v45 = vld [vmem:[#allocation2 + $0xb0] sm:$0xff]  ;;  %1119 = vst.msk [vmem:[%s1857_s11 + $0x54] sm:$0xf] %vm1097_vm4, %v1385_v39  ;;  %v911_v48 = vadd.f32 %v1845_v2, %v872_v44  ;;  %v873_v54 = vld [vmem:[#allocation2 + $0x38] sm:$0xff] }
 0x130   : > { %v927_v49 = vadd.f32 %v1845_v2, %v888_v45  ;;  %839 = vst.msk [vmem:[#allocation2 + $0x40] sm:$0xff] %vm264_vm0, %v806_v40  ;;  %855 = vst.msk [vmem:[#allocation2 + $0xc0] sm:$0xff] %vm264_vm0, %v822_v41  ;;  %v889_v55 = vld [vmem:[#allocation2 + $0xb8] sm:$0xff]  ;;  %v912_v58 = vadd.f32 %v1845_v2, %v873_v54 }
 0x131   : > { %v943_v56 = vmax.f32 %v911_v48, 0.0  ;;  %v928_v59 = vadd.f32 %v1845_v2, %v889_v55  ;;  %840 = vst.msk [vmem:[#allocation2 + $0x48] sm:$0xff] %vm264_vm0, %v807_v50  ;;  %856 = vst.msk [vmem:[#allocation2 + $0xc8] sm:$0xff] %vm264_vm0, %v823_v51 }
 0x132   : > { %v959_v57 = vmax.f32 %v927_v49, 0.0  ;;  %v944_v0 = vmax.f32 %v912_v58, 0.0  ;;  %v711_v3 = vpop.f32.mrb[20].mxu0  ;;  %v775_v4 = vpop.f32.mrb[20].mxu1 }
 0x133   : > { %v1370_v62 = vpack.c.bf16 %v943_v56, %v943_v56  ;;  %v960_v1 = vmax.f32 %v928_v59, 0.0  ;;  %v808_v9 = vadd.f32 %v711_v3, %v307_v60  ;;  %v824_v10 = vadd.f32 %v775_v4, %v323_v61  ;;  %v713_v11 = vpop.f32.mrb[21].mxu0  ;;  %v777_v12 = vpop.f32.mrb[21].mxu1  ;;  %v311_v61 = vld [vmem:[#allocation2 + $0x70] sm:$0xff] }
 0x134   : > { %v1386_v63 = vpack.c.bf16 %v959_v57, %v959_v57  ;;  %v1371_v7 = vpack.c.bf16 %v944_v0, %v944_v0  ;;  %v714_v15 = vpop.f32.mrb[22].mxu0  ;;  %v778_v16 = vpop.f32.mrb[22].mxu1 }
 0x135   : > { %1104 = vst.msk [vmem:[%s1857_s11 + $0x18] sm:$0xf] %vm1097_vm4, %v1370_v62  ;;  %v1387_v8 = vpack.c.bf16 %v960_v1, %v960_v1  ;;  %v809_v19 = vadd.f32 %v714_v15, %v308_v5  ;;  %v825_v20 = vadd.f32 %v778_v16, %v324_v6  ;;  %v716_v21 = vpop.f32.mrb[23].mxu0  ;;  %v780_v22 = vpop.f32.mrb[23].mxu1  ;;  %v327_v62 = vld [vmem:[#allocation2 + $0xf0] sm:$0xff]  ;;  %v312_v6 = vld [vmem:[#allocation2 + $0x78] sm:$0xff] }
 0x136   : > { %1120 = vst.msk [vmem:[%s1857_s11 + $0x58] sm:$0xf] %vm1097_vm4, %v1386_v63  ;;  %1105 = vst.msk [vmem:[%s1857_s11 + $0x1c] sm:$0xf] %vm1097_vm4, %v1371_v7  ;;  %v328_v7 = vld [vmem:[#allocation2 + $0xf8] sm:$0xff] }
 0x137   : > { %v874_v13 = vld [vmem:[#allocation2 + $0x40] sm:$0xff]  ;;  %1121 = vst.msk [vmem:[%s1857_s11 + $0x5c] sm:$0xf] %vm1097_vm4, %v1387_v8 }
 0x138   : > { %v890_v14 = vld [vmem:[#allocation2 + $0xc0] sm:$0xff]  ;;  %v913_v17 = vadd.f32 %v1845_v2, %v874_v13  ;;  %841 = vst.msk [vmem:[#allocation2 + $0x50] sm:$0xff] %vm264_vm0, %v808_v9  ;;  %857 = vst.msk [vmem:[#allocation2 + $0xd0] sm:$0xff] %vm264_vm0, %v824_v10  ;;  %v875_v23 = vld [vmem:[#allocation2 + $0x48] sm:$0xff] }
 0x139   : > { %v929_v18 = vadd.f32 %v1845_v2, %v890_v14  ;;  %v891_v24 = vld [vmem:[#allocation2 + $0xc8] sm:$0xff]  ;;  %v914_v27 = vadd.f32 %v1845_v2, %v875_v23  ;;  %842 = vst.msk [vmem:[#allocation2 + $0x58] sm:$0xff] %vm264_vm0, %v809_v19  ;;  %858 = vst.msk [vmem:[#allocation2 + $0xd8] sm:$0xff] %vm264_vm0, %v825_v20 }
 0x13a   : > { %v945_v25 = vmax.f32 %v913_v17, 0.0  ;;  %v930_v28 = vadd.f32 %v1845_v2, %v891_v24  ;;  %v719_v35 = vpop.f32.mrb[24].mxu0  ;;  %v783_v36 = vpop.f32.mrb[24].mxu1 }
 0x13b   : > { %v961_v26 = vmax.f32 %v929_v18, 0.0  ;;  %v946_v33 = vmax.f32 %v914_v27, 0.0  ;;  %v810_v41 = vadd.f32 %v719_v35, %v309_v29  ;;  %v826_v42 = vadd.f32 %v783_v36, %v325_v30  ;;  %v721_v43 = vpop.f32.mrb[25].mxu0  ;;  %v785_v44 = vpop.f32.mrb[25].mxu1 }
 0x13c   : > { %v1372_v31 = vpack.c.bf16 %v945_v25, %v945_v25  ;;  %v962_v34 = vmax.f32 %v930_v28, 0.0  ;;  %v722_v47 = vpop.f32.mrb[26].mxu0  ;;  %v786_v48 = vpop.f32.mrb[26].mxu1 }
 0x13d   : > { %v1388_v32 = vpack.c.bf16 %v961_v26, %v961_v26  ;;  %v1373_v39 = vpack.c.bf16 %v946_v33, %v946_v33  ;;  %843 = vst.msk [vmem:[#allocation2 + $0x60] sm:$0xff] %vm264_vm0, %v810_v41  ;;  %859 = vst.msk [vmem:[#allocation2 + $0xe0] sm:$0xff] %vm264_vm0, %v826_v42  ;;  %v811_v51 = vadd.f32 %v722_v47, %v310_v37  ;;  %v724_v53 = vpop.f32.mrb[27].mxu0  ;;  %v788_v54 = vpop.f32.mrb[27].mxu1 }
 0x13e   : > { %1106 = vst.msk [vmem:[%s1857_s11 + $0x20] sm:$0xf] %vm1097_vm4, %v1372_v31  ;;  %v1389_v40 = vpack.c.bf16 %v962_v34, %v962_v34  ;;  %v827_v52 = vadd.f32 %v786_v48, %v326_v38 }
 0x13f   : > { %1122 = vst.msk [vmem:[%s1857_s11 + $0x60] sm:$0xf] %vm1097_vm4, %v1388_v32  ;;  %v876_v45 = vld [vmem:[#allocation2 + $0x50] sm:$0xff]  ;;  %1107 = vst.msk [vmem:[%s1857_s11 + $0x24] sm:$0xf] %vm1097_vm4, %v1373_v39 }
 0x140   : > { %v892_v46 = vld [vmem:[#allocation2 + $0xd0] sm:$0xff]  ;;  %1123 = vst.msk [vmem:[%s1857_s11 + $0x64] sm:$0xf] %vm1097_vm4, %v1389_v40  ;;  %v915_v49 = vadd.f32 %v1845_v2, %v876_v45  ;;  %v877_v55 = vld [vmem:[#allocation2 + $0x58] sm:$0xff] }
 0x141   : > { %v931_v50 = vadd.f32 %v1845_v2, %v892_v46  ;;  %v893_v56 = vld [vmem:[#allocation2 + $0xd8] sm:$0xff]  ;;  %v916_v59 = vadd.f32 %v1845_v2, %v877_v55  ;;  %844 = vst.msk [vmem:[#allocation2 + $0x68] sm:$0xff] %vm264_vm0, %v811_v51  ;;  %860 = vst.msk [vmem:[#allocation2 + $0xe8] sm:$0xff] %vm264_vm0, %v827_v52 }
 0x142   : > { %v947_v57 = vmax.f32 %v915_v49, 0.0  ;;  %v932_v60 = vadd.f32 %v1845_v2, %v893_v56  ;;  %v727_v4 = vpop.f32.mrb[28].mxu0  ;;  %v791_v5 = vpop.f32.mrb[28].mxu1 }
 0x143   : > { %v963_v58 = vmax.f32 %v931_v50, 0.0  ;;  %v948_v1 = vmax.f32 %v916_v59, 0.0  ;;  %v812_v10 = vadd.f32 %v727_v4, %v311_v61  ;;  %v828_v11 = vadd.f32 %v791_v5, %v327_v62  ;;  %v729_v12 = vpop.f32.mrb[29].mxu0  ;;  %v793_v13 = vpop.f32.mrb[29].mxu1 }
 0x144   : > { %v1374_v63 = vpack.c.bf16 %v947_v57, %v947_v57  ;;  %v964_v3 = vmax.f32 %v932_v60, 0.0  ;;  %v878_v14 = vld [vmem:[#allocation2 + $0x60] sm:$0xff]  ;;  %v730_v16 = vpop.f32.mrb[30].mxu0  ;;  %v794_v17 = vpop.f32.mrb[30].mxu1 }
 0x145   : > { %v1390_v0 = vpack.c.bf16 %v963_v58, %v963_v58  ;;  %v1375_v8 = vpack.c.bf16 %v948_v1, %v948_v1  ;;  %v894_v15 = vld [vmem:[#allocation2 + $0xe0] sm:$0xff]  ;;  %v917_v18 = vadd.f32 %v1845_v2, %v878_v14  ;;  %845 = vst.msk [vmem:[#allocation2 + $0x70] sm:$0xff] %vm264_vm0, %v812_v10  ;;  %861 = vst.msk [vmem:[#allocation2 + $0xf0] sm:$0xff] %vm264_vm0, %v828_v11  ;;  %v732_v22 = vpop.f32.mrb[31].mxu0  ;;  %v796_v23 = vpop.f32.mrb[31].mxu1 }
 0x146   : > { %1108 = vst.msk [vmem:[%s1857_s11 + $0x28] sm:$0xf] %vm1097_vm4, %v1374_v63  ;;  %v1391_v9 = vpack.c.bf16 %v964_v3, %v964_v3  ;;  %v933_v19 = vadd.f32 %v1845_v2, %v894_v15  ;;  %v813_v20 = vadd.f32 %v730_v16, %v312_v6  ;;  %v829_v21 = vadd.f32 %v794_v17, %v328_v7 }
 0x147   : > { %1124 = vst.msk [vmem:[%s1857_s11 + $0x68] sm:$0xf] %vm1097_vm4, %v1390_v0  ;;  %1109 = vst.msk [vmem:[%s1857_s11 + $0x2c] sm:$0xf] %vm1097_vm4, %v1375_v8  ;;  %v949_v26 = vmax.f32 %v917_v18, 0.0 }
 0x148   : > { %1125 = vst.msk [vmem:[%s1857_s11 + $0x6c] sm:$0xf] %vm1097_vm4, %v1391_v9  ;;  %v879_v24 = vld [vmem:[#allocation2 + $0x68] sm:$0xff]  ;;  %v965_v27 = vmax.f32 %v933_v19, 0.0 }
 0x149   : > { %v895_v25 = vld [vmem:[#allocation2 + $0xe8] sm:$0xff]  ;;  %v918_v28 = vadd.f32 %v1845_v2, %v879_v24  ;;  %846 = vst.msk [vmem:[#allocation2 + $0x78] sm:$0xff] %vm264_vm0, %v813_v20  ;;  %862 = vst.msk [vmem:[#allocation2 + $0xf8] sm:$0xff] %vm264_vm0, %v829_v21  ;;  %v1376_v30 = vpack.c.bf16 %v949_v26, %v949_v26 }
 0x14a   : > { %v934_v29 = vadd.f32 %v1845_v2, %v895_v25  ;;  %v1392_v31 = vpack.c.bf16 %v965_v27, %v965_v27 }
 0x14b   : > { %v950_v32 = vmax.f32 %v918_v28, 0.0  ;;  %1110 = vst.msk [vmem:[%s1857_s11 + $0x30] sm:$0xf] %vm1097_vm4, %v1376_v30 }
 0x14c   : > { %v966_v33 = vmax.f32 %v934_v29, 0.0  ;;  %1126 = vst.msk [vmem:[%s1857_s11 + $0x70] sm:$0xf] %vm1097_vm4, %v1392_v31  ;;  %v880_v36 = vld [vmem:[#allocation2 + $0x70] sm:$0xff] }
 0x14d   : > { %v1377_v34 = vpack.c.bf16 %v950_v32, %v950_v32  ;;  %v896_v37 = vld [vmem:[#allocation2 + $0xf0] sm:$0xff]  ;;  %v919_v38 = vadd.f32 %v1845_v2, %v880_v36 }
 0x14e   : > { %v1393_v35 = vpack.c.bf16 %v966_v33, %v966_v33  ;;  %v935_v39 = vadd.f32 %v1845_v2, %v896_v37 }
 0x14f   : > { %1111 = vst.msk [vmem:[%s1857_s11 + $0x34] sm:$0xf] %vm1097_vm4, %v1377_v34  ;;  %v951_v42 = vmax.f32 %v919_v38, 0.0 }
 0x150   : > { %1127 = vst.msk [vmem:[%s1857_s11 + $0x74] sm:$0xf] %vm1097_vm4, %v1393_v35  ;;  %v881_v40 = vld [vmem:[#allocation2 + $0x78] sm:$0xff]  ;;  %v967_v43 = vmax.f32 %v935_v39, 0.0 }
 0x151   : > { %v897_v41 = vld [vmem:[#allocation2 + $0xf8] sm:$0xff]  ;;  %v920_v44 = vadd.f32 %v1845_v2, %v881_v40  ;;  %v1378_v46 = vpack.c.bf16 %v951_v42, %v951_v42 }
 0x152   : > { %v936_v45 = vadd.f32 %v1845_v2, %v897_v41  ;;  %v1394_v47 = vpack.c.bf16 %v967_v43, %v967_v43 }
 0x153   : > { %v952_v48 = vmax.f32 %v920_v44, 0.0  ;;  %1112 = vst.msk [vmem:[%s1857_s11 + $0x38] sm:$0xf] %vm1097_vm4, %v1378_v46 }
 0x154   : > { %v968_v49 = vmax.f32 %v936_v45, 0.0  ;;  %1128 = vst.msk [vmem:[%s1857_s11 + $0x78] sm:$0xf] %vm1097_vm4, %v1394_v47 }
 0x155   : > { %v1379_v2 = vpack.c.bf16 %v952_v48, %v952_v48 }
 0x156   : > { %v1395_v50 = vpack.c.bf16 %v968_v49, %v968_v49 }
 0x157   : > { %1113 = vst.msk [vmem:[%s1857_s11 + $0x3c] sm:$0xf] %vm1097_vm4, %v1379_v2 }
 0x158   : > { %1129 = vst.msk [vmem:[%s1857_s11 + $0x7c] sm:$0xf] %vm1097_vm4, %v1395_v50 }
 0x159   : > { %1548 = shalt.err (!%p1545_p5)
}
 0x15a   : > { %s1549_s4 = scalar_lea.hbm %s1972_s26, 2048  ;;  %s1553_s7 = scalar_lea.hbm %s2035_s3, 16384 }
 0x15b   : > { %p1550_p6 = scmp.ne.s32.totalorder %s1972_s26, %s1549_s4  ;;  %p1554_p10 = scmp.lt.u32.totalorder %s1972_s26, %s2035_s3 }
 0x15c   : > { %p1555_p11 = scmp.lt.u32.totalorder %s1553_s7, %s1549_s4  ;;  %p1557_p13 = scmp.lt.u32.totalorder %s1549_s4, %s1972_s26 }
 0x15d   : > { %p1551_p7 = pnand %p1550_p6, %p1681_p4 }
 0x15e   : > { %p1556_p12 = por %p1555_p11, %p1554_p10 }
 0x15f   : > { %p1552_p9 = pneg %p1551_p7 }
 0x160   : > { %p1558_p0 = por %p1557_p13, %p1556_p12 }
 0x162   : > { %p1559_p1 = pnand %p1558_p0, %p1552_p9 }
 0x164   : > { %1562 = shalt.err (!%p1559_p1)
}
 0x165   : > { %s1619_s10 = smov 64   ;;  %s1620_s11 = smov 4  }
 0x166   : > { %1417 = dma.vmem_to_hbm [thread:$0]  (%p1681_p4), %s1974_s19, 2048, %s1972_s26, %s1986_s15, %s1619_s10, %s1619_s10, %s1620_s11  }
 0x167 PF: > { %p1423_p2 = scmp.ge.s32.totalorder %s1613_s17, 2  ;;  %s1160_s18 = sand.u32 1, %s1593_s12  }
 0x168   : > { %s1161_s21 = scalar_lea.sflag [#allocation4], %s1160_s18 }
 0x169   : > { %p1420_p3 = pnand %p1423_p2, %p1688_p8 }
 0x16b   : > { %1588 = dma.done.wait (!%p1420_p3), %s1161_s21, 2048  }
 0x16c   : > { %1590 = vsyncadd (!%p1420_p3), %s1161_s21, 4294965248  ;;  %s16_s17 = sadd.s32 1, %s1613_s17   ;;  %s2038_s12 = smov %s1597_s13 }
 0x16d   : > { %p13_p5 = scmp.ge.s32.totalorder %s16_s17, 10   ;;  %s2039_s13 = smov %s1601_s14 }
 0x16e   : > { %s2040_s14 = smov %s1694_s25  ;;  %s2041_s15 = smov %s1609_s16 }
 0x16f   : > { %s2042_s16 = smov %s2044_s20  ;;  %15 = sbr.rel (!%p13_p5) target bundleno = 4 (0x4), region = 81 }
 0x176   :  { %1166 = vsyncpa [#allocation4], 1 }
 0x177   :  { %1168 = vsyncpa [#allocation4 + $0x1], 1 }

</bundles_post_ra>
